<compile_context>
chip_gen: v6e
topology: v6e:2x2x1
jax: 0.10.0
libtpu: 0.0.40
codegen_flags: <defaults>
</compile_context>

<pallas_src>
import jax
import jax.numpy as jnp
from jax.experimental import pallas as pl
from jax.experimental.pallas import tpu as pltpu


def _round_up(x, m):
    return ((x + m - 1) // m) * m


def _nethead_kernel(p_ref, w_ref, b_ref, o_ref):
    # p_ref: (TM, Kp)     bf16 im2col patch rows
    # w_ref: (Kp, Coutp)  bf16 conv weights with BN scale folded in
    # b_ref: (1, Coutp)   f32 folded BN bias
    # o_ref: (TM, Coutp)
    acc = jnp.dot(p_ref[...], w_ref[...], preferred_element_type=jnp.float32)
    y = jnp.maximum(acc + b_ref[...], 0.0)          # bias + ReLU epilogue
    o_ref[...] = y.astype(o_ref.dtype)


def nethead_forward(x_nchw, conv_w_oihw, bn_gamma, bn_beta, bn_mean, bn_var,
                    eps=1e-5):
    """NetHead forward. x_nchw: (N, Cin, H, W) -> (N, Cout, H, W)."""
    N, Cin, H, W = x_nchw.shape
    Cout = conv_w_oihw.shape[0]

    # ---- wrapper-side layout work (cheap XLA ops at these sizes) ------------
    # NCHW -> NHWC, spatial zero-pad by 1 (conv padding=1).
    x_nhwc = jnp.transpose(x_nchw, (0, 2, 3, 1))
    x_pad = jnp.pad(x_nhwc, ((0, 0), (1, 1), (1, 1), (0, 0)))

    # im2col: (N*H*W, 9*Cin), K index = (dy*3 + dx)*Cin + cin.
    cols = [x_pad[:, dy:dy + H, dx:dx + W, :]
            for dy in range(3) for dx in range(3)]
    K = 9 * Cin
    M = N * H * W
    patches = jnp.concatenate(cols, axis=-1).reshape(M, K)

    # OIHW -> HWIO -> (9*Cin, Cout); fold eval-mode BN scale into the weights.
    w2d = jnp.transpose(conv_w_oihw, (2, 3, 1, 0)).reshape(K, Cout)
    w2d = w2d.astype(jnp.float32)
    scale = (bn_gamma / jnp.sqrt(bn_var + eps)).astype(jnp.float32)
    bias = (bn_beta.astype(jnp.float32) - bn_mean.astype(jnp.float32) * scale)
    w2d = w2d * scale[None, :]

    # Lane-dense padding: K and Cout up to multiples of 128, rows up to TM.
    Kp = _round_up(K, 128)
    Coutp = _round_up(Cout, 128)
    TM = 256 if M >= 256 else _round_up(M, 8)
    Mp = _round_up(M, TM)

    patches_p = jnp.pad(patches, ((0, Mp - M), (0, Kp - K))).astype(jnp.bfloat16)
    w_p = jnp.pad(w2d, ((0, Kp - K), (0, Coutp - Cout))).astype(jnp.bfloat16)
    bias_p = jnp.pad(bias, (0, Coutp - Cout)).reshape(1, Coutp)

    grid = (Mp // TM,)

    out_p = pl.pallas_call(
        _nethead_kernel,
        out_shape=jax.ShapeDtypeStruct((Mp, Coutp), x_nchw.dtype),
        grid_spec=pltpu.PrefetchScalarGridSpec(
            num_scalar_prefetch=0,
            grid=grid,
            in_specs=[
                pl.BlockSpec((TM, Kp), lambda i: (i, 0)),
                pl.BlockSpec((Kp, Coutp), lambda i: (0, 0)),
                pl.BlockSpec((1, Coutp), lambda i: (0, 0)),
            ],
            out_specs=pl.BlockSpec((TM, Coutp), lambda i: (i, 0)),
        ),
        compiler_params=pltpu.CompilerParams(
            dimension_semantics=("parallel",)),
    )(patches_p, w_p, bias_p)

    # Drop padding, back to NCHW to match the PyTorch output convention.
    out = out_p[:M, :Cout].reshape(N, H, W, Cout)
    return jnp.transpose(out, (0, 3, 1, 2))


def _reference_forward(x_nchw, conv_w_oihw, bn_gamma, bn_beta, bn_mean, bn_var,
                       eps=1e-5):
    """Pure-JAX f32 reference (lax conv) for correctness checking."""
    y = jax.lax.conv_general_dilated(
        x_nchw.astype(jnp.float32), conv_w_oihw.astype(jnp.float32),
        window_strides=(1, 1), padding=((1, 1), (1, 1)),
        dimension_numbers=("NCHW", "OIHW", "NCHW"))
    scale = bn_gamma / jnp.sqrt(bn_var + eps)
    bias = bn_beta - bn_mean * scale
    y = y * scale[None, :, None, None] + bias[None, :, None, None]
    return jnp.maximum(y, 0.0)


if __name__ == "__main__":
    # Small shapes consistent with the module (input_dim -> final_dim, 3x3 conv).
    N, Cin, H, W = 2, 8, 16, 16
    Cout = 8

    key = jax.random.PRNGKey(0)
    kx, kw = jax.random.split(key)

    x = jax.random.normal(kx, (N, Cin, H, W), dtype=jnp.float32)
    # Conv2d weight (Cout, Cin, 3, 3), bias=False; deterministic init.
    conv_w = jax.random.normal(kw, (Cout, Cin, 3, 3), dtype=jnp.float32) * 0.1

    # BatchNorm2d parameters at PyTorch init values (eval-mode running stats).
    gamma = jnp.ones((Cout,), jnp.float32)
    beta = jnp.zeros((Cout,), jnp.float32)
    run_mean = jnp.zeros((Cout,), jnp.float32)
    run_var = jnp.ones((Cout,), jnp.float32)

    out = nethead_forward(x, conv_w, gamma, beta, run_mean, run_var)
    out = jax.block_until_ready(out)

    ref = _reference_forward(x, conv_w, gamma, beta, run_mean, run_var)
    assert out.shape == (N, Cout, H, W)
    # bf16 MXU operands (f32 accumulate) => loosened tolerance vs f32 reference.
    assert jnp.allclose(out, ref, atol=5e-2, rtol=5e-2), "mismatch vs reference"

    print("KERNEL_OK")
</pallas_src>

<mosaic_0001>
module attributes {stable_mosaic.version = 11 : i64} {
  func.func @_nethead_kernel(%arg0: i32, %arg1: memref<256x128xbf16, #tpu.memory_space<vmem>>, %arg2: memref<128x128xbf16, #tpu.memory_space<vmem>>, %arg3: memref<1x128xf32, #tpu.memory_space<vmem>>, %arg4: memref<256x128xf32, #tpu.memory_space<vmem>>) attributes {dimension_semantics = [#tpu.dimension_semantics<parallel>], iteration_bounds = array<i64: 2>, scalar_prefetch = 0 : i64, scratch_operands = 0 : i64, tpu.core_type = #tpu.core_type<tc>, window_params = [{transform_indices = @transform_0, window_bounds = array<i64: 256, 128>}, {pipeline_mode = #tpu.pipeline_mode<synchronous>, transform_indices = @transform_1, window_bounds = array<i64: 128, 128>}, {pipeline_mode = #tpu.pipeline_mode<synchronous>, transform_indices = @transform_2, window_bounds = array<i64: 1, 128>}, {transform_indices = @transform_3, window_bounds = array<i64: 256, 128>}]} {
    %c0 = arith.constant 0 : index
    %c0_0 = arith.constant 0 : index
    %0 = vector.load %arg1[%c0, %c0_0] : memref<256x128xbf16, #tpu.memory_space<vmem>>, vector<256x128xbf16>
    %c0_1 = arith.constant 0 : index
    %c0_2 = arith.constant 0 : index
    %1 = vector.load %arg2[%c0_1, %c0_2] : memref<128x128xbf16, #tpu.memory_space<vmem>>, vector<128x128xbf16>
    %cst = arith.constant dense<0.000000e+00> : vector<256x128xf32>
    %2 = tpu.matmul %0, %1, %cst {dimension_numbers = #tpu.dot_dimension_numbers<[1], [0], [0], [1], [0, 0, 1, 1], [], []>} : vector<256x128xbf16>, vector<128x128xbf16>, vector<256x128xf32> -> vector<256x128xf32>
    %c0_3 = arith.constant 0 : index
    %c0_4 = arith.constant 0 : index
    %3 = vector.load %arg3[%c0_3, %c0_4] : memref<1x128xf32, #tpu.memory_space<vmem>>, vector<1x128xf32>
    %4 = vector.broadcast %3 : vector<1x128xf32> to vector<256x128xf32>
    %5 = arith.addf %2, %4 : vector<256x128xf32>
    %cst_5 = arith.constant 0.000000e+00 : f32
    %6 = vector.broadcast %cst_5 : f32 to vector<256x128xf32>
    %7 = arith.maximumf %5, %6 : vector<256x128xf32>
    %c0_6 = arith.constant 0 : index
    %c0_7 = arith.constant 0 : index
    %8 = vector.load %arg4[%c0_6, %c0_7] : memref<256x128xf32, #tpu.memory_space<vmem>>, vector<256x128xf32>
    tpu.vector_store %arg4[%c0_6, %c0_7], %7 {strides = array<i32>} : memref<256x128xf32, #tpu.memory_space<vmem>>, vector<256x128xf32>,
    return
  }
  func.func @transform_0(%arg0: i32) -> (i32, i32) {
    %c0_i32 = arith.constant 0 : i32
    %c0_i32_0 = arith.constant 0 : i32
    return %arg0, %c0_i32 : i32, i32
  }
  func.func @transform_1(%arg0: i32) -> (i32, i32) {
    %c0_i32 = arith.constant 0 : i32
    %c0_i32_0 = arith.constant 0 : i32
    %c0_i32_1 = arith.constant 0 : i32
    return %c0_i32, %c0_i32_0 : i32, i32
  }
  func.func @transform_2(%arg0: i32) -> (i32, i32) {
    %c0_i32 = arith.constant 0 : i32
    %c0_i32_0 = arith.constant 0 : i32
    %c0_i32_1 = arith.constant 0 : i32
    return %c0_i32, %c0_i32_0 : i32, i32
  }
  func.func @transform_3(%arg0: i32) -> (i32, i32) {
    %c0_i32 = arith.constant 0 : i32
    %c0_i32_0 = arith.constant 0 : i32
    return %arg0, %c0_i32 : i32, i32
  }
}

</mosaic_0001>

<bundles_post_ra>
// kernel: tpu_custom_call.1
= control target key start
LH: loop header
LB: loop body
LE: loop exit
PB: predicated region body
PF: predicated region fallthrough
CT: control target
= control target key end

     0   :  { %8 = vsyncpa [#allocation3], 0  ;;  %s1369_s0 = inlined_call_operand.hbm [shape: bf16[512,128], index: 0, kind: input, shape index: {}]   ;;  %s1370_s1 = inlined_call_operand.hbm [shape: bf16[128,128], index: 1, kind: input, shape index: {}]   ;;  %s1371_s2 = inlined_call_operand.vmem [shape: f32[1,128], index: 2, kind: input, shape index: {}]   ;;  %s1372_s3 = inlined_call_operand.hbm [shape: f32[512,128], index: 3, kind: output, shape index: {}]  }
   0x1   :  { %10 = vsyncpa [#allocation3 + $0x1], 0 }
   0x2   :  { %11 = vsyncpa [#allocation6], 0 }
   0x3   :  { %12 = vsyncpa [#allocation4], 0 }
   0x4   :  { %14 = vsyncpa [#allocation4 + $0x1], 0  ;;  %s1095_s12 = smov 0   ;;  %s1097_s13 = smov 0  }
   0x5   :  { %s1099_s14 = smov 0   ;;  %s1101_s15 = smov 0  }
   0x6 LB: > { %s1116_s16 = sadd.s32 4294967295, %s1066_s15   ;;  %s728_s17 = sadd.s32 4294967294, %s1066_s15   ;;  %s1066_s15 = sphi %s1101_s15, %s1394_s15   ;;  %s1062_s14 = sphi %s1099_s14, %s1393_s14   ;;  %s1058_s13 = sphi %s1097_s13, %s1392_s13   ;;  %s1054_s12 = sphi %s1095_s12, %s1391_s12  }
   0x7   : > { %p40_p0 = scmp.ne.s32.totalorder %s1058_s13, %s1054_s12  ;;  %p1373_p1 = scmp.eq.s32.totalorder %s1116_s16, 0 }
   0x8   : > { %p112_p3 = scmp.eq.s32.totalorder %s728_s17, 1  ;;  %p729_p5 = scmp.ge.s32.totalorder %s1066_s15, 1 }
   0x9   : > { %p1125_p4 = por %p1373_p1, %p40_p0  ;;  %p119_p7 = scmp.lt.s32.totalorder %s1066_s15, 3 }
   0xa   : > { %p1130_p6 = por %p112_p3, %p40_p0  ;;  %s1068_s21 = smov [#allocation5]  }
   0xb   : > { %s1377_s18 = scalar_select %p1125_p4, 1, 0 }
   0xc   : > { %s1378_s19 = scalar_select %p1130_p6, 1, 0 }
   0xd   : > { %p1135_p8 = pnand %p729_p5, %p119_p7  ;;  %s131_s22 = sshll.u32 %s1068_s21, 4  ;;  %s132_s22 = int_to_ptr.vmem [resolvable:$true] %s131_s22 }
   0xe   : > { %s1149_s24 = sadd.s32 1, %s1066_s15   ;;  %s27_s25 = sadd.s32 1, %s1062_s14 }
   0xf   : > { %s1379_s20 = scalar_select %p1135_p8, 1, 0 }
  0x10   : > { %p867_p9 = pneg %p1135_p8  ;;  %s24_s26 = ssub.s32 %s1066_s15, %s1149_s24 }
  0x11   : > { %s955_s27 = scalar_lea.vmem %s132_s22, 1024  ;;  %p963_p5 = scmp.lt.s32.totalorder %s132_s22, %s132_s22 }
  0x12   : > { %p1144_p11 = pnand %p867_p9, %p1373_p1  ;;  %p956_p13 = scmp.ne.s32.totalorder %s132_s22, %s955_s27 }
  0x13   : > { %p964_p7 = scmp.lt.s32.totalorder %s955_s27, %s955_s27 }
  0x14   : > { %p946_p12 = pneg %p1144_p11 }
  0x15   : > { %p965_p10 = por %p964_p7, %p963_p5 }
  0x16   : > { %p958_p0 = pnand %p956_p13, %p946_p12 }
  0x18   : > { %p959_p3 = pneg %p958_p0 }
  0x1a   : > { %p966_p2 = pnand %p965_p10, %p959_p3 }
  0x1c   : > { %969 = shalt.err (!%p966_p2)
}
  0x1d   : > { %s1069_s28 = smov 64   ;;  %s1070_s29 = smov 4  }
  0x1e   : > { %870 = dma.hbm_to_vmem [thread:$0]  (!%p1144_p11), %s1370_s1, 1024, %s132_s22, [#allocation6], %s1069_s28, %s1069_s28, %s1070_s29  }
  0x1f   : > { %p25_p2 = scmp.eq.s32.totalorder %s24_s26, 0  ;;  %p34_p9 = scmp.ne.s32.totalorder %s1062_s14, %s1058_s13 }
  0x20   : > { %p35_p10 = scmp.eq.s32.totalorder %s1066_s15, 0  ;;  %p880_p12 = scmp.lt.s32.totalorder %s1066_s15, 2 }
  0x21   : > { %s1169_s5 = scalar_select %p25_p2, %s1062_s14, %s27_s25  }
  0x22   : > { %p36_p13 = por %p35_p10, %p34_p9  ;;  %p1381_p0 = scmp.eq.s32.totalorder %s1116_s16, 1 }
  0x23   : > { %s148_s7 = sand.u32 1, %s1062_s14   ;;  %s769_s8 = sshll.u32 %s1066_s15, 11 }
  0x24   : > { %p1173_p3 = por %p1381_p0, %p34_p9  ;;  %s732_s9 = sshll.u32 %s148_s7, 7 }
  0x25   : > { %s1182_s17 = scalar_lea.hbm %s1369_s0, %s769_s8  ;;  %s152_s21 = scalar_lea.vmem [#allocation2], %s732_s9 }
  0x26   : > { %s1382_s6 = scalar_select %p1173_p3, 1, 0 }
  0x27   : > { %s159_s22 = sshll.u32 %s152_s21, 4  ;;  %p1184_p11 = pnand %p880_p12, %p36_p13  ;;  %s1188_s22 = int_to_ptr.vmem [resolvable:$true] %s159_s22 }
  0x28   : > { %s1190_s25 = scalar_lea.sflag [#allocation3], %s148_s7  ;;  %s970_s26 = scalar_lea.hbm %s1182_s17, 2048 }
  0x29   : > { %p971_p5 = scmp.ne.s32.totalorder %s1182_s17, %s970_s26  ;;  %p972_p7 = pneg %p1184_p11 }
  0x2a   : > { %s975_s4 = scalar_lea.hbm %s1369_s0, 4096  ;;  %p976_p10 = scmp.lt.s32.totalorder %s1182_s17, %s1369_s0 }
  0x2b   : > { %p973_p2 = pnand %p972_p7, %p971_p5  ;;  %p977_p12 = scmp.lt.s32.totalorder %s975_s4, %s970_s26 }
  0x2d   : > { %p974_p9 = pneg %p973_p2  ;;  %p978_p13 = por %p977_p12, %p976_p10 }
  0x2f   : > { %p979_p0 = pnand %p978_p13, %p974_p9 }
  0x31   : > { %982 = shalt.err (!%p979_p0)
}
  0x32   : > { %s983_s7 = scalar_lea.vmem %s1188_s22, 2048  ;;  %s1071_s10 = smov [#allocation2]  }
  0x33   : > { %p984_p1 = scmp.ne.s32.totalorder %s1188_s22, %s983_s7  ;;  %s988_s11 = sshll.u32 %s1071_s10, 4  ;;  %s989_s11 = int_to_ptr.vmem [resolvable:$false] %s988_s11 }
  0x34   : > { %s990_s21 = scalar_lea.vmem %s989_s11, 4096  ;;  %p991_p2 = scmp.lt.s32.totalorder %s1188_s22, %s989_s11 }
  0x35   : > { %p986_p6 = pnand %p984_p1, %p972_p7  ;;  %p992_p3 = scmp.lt.s32.totalorder %s990_s21, %s983_s7 }
  0x37   : > { %p987_p5 = pneg %p986_p6  ;;  %p993_p4 = por %p992_p3, %p991_p2 }
  0x39   : > { %p994_p8 = pnand %p993_p4, %p987_p5 }
  0x3b   : > { %997 = shalt.err (!%p994_p8)
}
  0x3c   : > { %874 = dma.hbm_to_vmem [thread:$0]  (!%p1184_p11), %s1182_s17, 2048, %s1188_s22, %s1190_s25, %s1069_s28, %s1069_s28, %s1070_s29  }
  0x3d   : > { %p1384_p1 = scmp.ne.s32.totalorder %s1379_s20, 0 }
  0x3e   : > { %s1217_s26 = sand.u32 (!%p1384_p1), 1, %s1058_s13   ;;  %p1385_p4 = scmp.ne.s32.totalorder (!%p1384_p1), %s1377_s18, 0 }
  0x3f   : > { %171 = sbr.rel (%p1384_p1) target bundleno = 346 (0x15a), region = 32  ;;  %s736_s27 = sshll.u32 (!%p1384_p1), %s1217_s26, 7 }
  0x40   : > { %s174_s30 = scalar_lea.sflag (!%p1384_p1), [#allocation3], %s1217_s26  ;;  %s1221_s4 = scalar_lea.vmem (!%p1384_p1), [#allocation2], %s736_s27 }
  0x44   : > { %1041 = dma.done.wait (%p1385_p4), %s174_s30, 2048  }
  0x45   : > { %1043 = vsyncadd (%p1385_p4), %s174_s30, 4294965248  ;;  %p1386_p6 = scmp.eq.s32.totalorder %s1116_s16, 0 }
  0x47   : > { %1045 = dma.done.wait (%p1386_p6), [#allocation6], 1024   ;;  %p1387_p8 = pmov %p1386_p6 }
  0x48   : > { %v920_v0 = vld [vmem:[#allocation5 + $0x38] sm:$0xff]   ;;  %v921_v1 = vld [vmem:[#allocation5 + $0x30] sm:$0xff]   ;;  %v922_v2 = vld [vmem:[#allocation5 + $0x28] sm:$0xff]   ;;  %s738_s28 = sshll.u32 %s1217_s26, 8  ;;  %s770_s17 = sshll.u32 %s1116_s16, 12 }
  0x49   : > { %1047 = vsyncadd (%p1387_p8), [#allocation6], 4294966272  ;;  %795 = vmatprep.subr.bf16.mxu0 %v920_v0  ;;  %843 = vmatprep.subr.bf16.mxu1 %v920_v0  ;;  %v923_v3 = vld [vmem:[#allocation5 + $0x20] sm:$0xff]   ;;  %v924_v6 = vld [vmem:[#allocation5 + $0x18] sm:$0xff]   ;;  %s1257_s29 = scalar_lea.vmem [#allocation7], %s738_s28  ;;  %s1320_s8 = scalar_lea.hbm %s1372_s3, %s770_s17 }
  0x4a   : > { %796 = vmatpush3.bf16.msra.mxu0 %v920_v0  ;;  %851 = vmatpush3.bf16.msra.mxu1 %v920_v0  ;;  %v928_v4 = vld [vmem:[%s1221_s4] sm:$0xff]   ;;  %v925_v7 = vld [vmem:[#allocation5 + $0x10] sm:$0xff]   ;;  %v926_v8 = vld [vmem:[#allocation5 + $0x8] sm:$0xff]   ;;  %s645_s22 = sshll.u32 %s1257_s29, 4  ;;  %s632_s16 = scalar_lea.sflag [#allocation4], %s1217_s26  ;;  %s1322_s22 = int_to_ptr.vmem [resolvable:$true] %s645_s22 }
  0x4b   : > { %797 = vmatprep.subr.bf16.mxu0 %v921_v1  ;;  %844 = vmatprep.subr.bf16.mxu1 %v921_v1  ;;  %v929_v5 = vld [vmem:[%s1221_s4 + $0x40] sm:$0xff]   ;;  %v930_v10 = vld [vmem:[%s1221_s4 + $0x8] sm:$0xff]   ;;  %v932_v12 = vld [vmem:[%s1221_s4 + $0x10] sm:$0xff]   ;;  %s998_s9 = scalar_lea.vmem %s1322_s22, 4096  ;;  %p1388_p11 = scmp.ne.s32.totalorder %s1382_s6, 0 }
  0x4c   : > { %811 = vmatprep.mubr.bf16.mxu0 %v928_v4  ;;  %827 = vmatprep.mubr.bf16.mxu1 %v929_v5  ;;  %v927_v9 = vld [vmem:[#allocation5] sm:$0xff]   ;;  %v931_v11 = vld [vmem:[%s1221_s4 + $0x48] sm:$0xff]   ;;  %v933_v13 = vld [vmem:[%s1221_s4 + $0x50] sm:$0xff]   ;;  %p999_p3 = scmp.ne.s32.totalorder %s1322_s22, %s998_s9  ;;  %s1072_s7 = smov [#allocation7]  }
  0x4d   : > { %v934_v14 = vld [vmem:[%s1221_s4 + $0x18] sm:$0xff]   ;;  %v936_v16 = vld [vmem:[%s1221_s4 + $0x20] sm:$0xff]   ;;  %v938_v18 = vld [vmem:[%s1221_s4 + $0x28] sm:$0xff]   ;;  %s1002_s10 = sshll.u32 %s1072_s7, 4  ;;  %s1003_s10 = int_to_ptr.vmem [resolvable:$false] %s1002_s10 }
  0x4e   : > { %798 = vmatpush3.bf16.msra.mxu0 %v921_v1  ;;  %852 = vmatpush3.bf16.msra.mxu1 %v921_v1  ;;  %v935_v15 = vld [vmem:[%s1221_s4 + $0x58] sm:$0xff]   ;;  %v937_v17 = vld [vmem:[%s1221_s4 + $0x60] sm:$0xff]   ;;  %v939_v19 = vld [vmem:[%s1221_s4 + $0x68] sm:$0xff]   ;;  %p1000_p7 = pnand %p999_p3, %p1388_p11  ;;  %s1004_s11 = scalar_lea.vmem %s1003_s10, 8192 }
  0x4f   : > { %799 = vmatprep.subr.bf16.mxu0 %v922_v2  ;;  %845 = vmatprep.subr.bf16.mxu1 %v922_v2  ;;  %v940_v20 = vld [vmem:[%s1221_s4 + $0x30] sm:$0xff]   ;;  %v942_v22 = vld [vmem:[%s1221_s4 + $0x38] sm:$0xff]   ;;  %v1250_v24 = vld [vmem:[%s1371_s2] ss:$0 sm:$0xff]  ;;  %p1005_p10 = scmp.lt.s32.totalorder %s1322_s22, %s1003_s10  ;;  %p1006_p12 = scmp.lt.s32.totalorder %s1004_s11, %s998_s9 }
  0x50   : > { %v941_v21 = vld [vmem:[%s1221_s4 + $0x70] sm:$0xff]   ;;  %v943_v23 = vld [vmem:[%s1221_s4 + $0x78] sm:$0xff]   ;;  %p1001_p9 = pneg %p1000_p7 }
  0x51   : > { %p1007_p13 = por %p1006_p12, %p1005_p10 }
  0x52   : > { %800 = vmatpush3.bf16.msra.mxu0 %v922_v2  ;;  %853 = vmatpush3.bf16.msra.mxu1 %v922_v2 }
  0x53   : > { %801 = vmatprep.subr.bf16.mxu0 %v923_v3  ;;  %846 = vmatprep.subr.bf16.mxu1 %v923_v3  ;;  %p1008_p0 = pnand %p1007_p13, %p1001_p9 }
  0x56   : > { %802 = vmatpush3.bf16.msra.mxu0 %v923_v3  ;;  %854 = vmatpush3.bf16.msra.mxu1 %v923_v3 }
  0x57   : > { %803 = vmatprep.subr.bf16.mxu0 %v924_v6  ;;  %847 = vmatprep.subr.bf16.mxu1 %v924_v6 }
  0x5a   : > { %804 = vmatpush3.bf16.msra.mxu0 %v924_v6  ;;  %855 = vmatpush3.bf16.msra.mxu1 %v924_v6 }
  0x5b   : > { %805 = vmatprep.subr.bf16.mxu0 %v925_v7  ;;  %848 = vmatprep.subr.bf16.mxu1 %v925_v7 }
  0x5e   : > { %806 = vmatpush3.bf16.msra.mxu0 %v925_v7  ;;  %856 = vmatpush3.bf16.msra.mxu1 %v925_v7 }
  0x5f   : > { %807 = vmatprep.subr.bf16.mxu0 %v926_v8  ;;  %849 = vmatprep.subr.bf16.mxu1 %v926_v8 }
  0x62   : > { %808 = vmatpush3.bf16.msra.mxu0 %v926_v8  ;;  %857 = vmatpush3.bf16.msra.mxu1 %v926_v8 }
  0x63   : > { %809 = vmatprep.subr.bf16.mxu0 %v927_v9  ;;  %850 = vmatprep.subr.bf16.mxu1 %v927_v9 }
  0x66   : > { %810 = vmatpush3.bf16.msra.mxu0 %v927_v9  ;;  %858 = vmatpush3.bf16.msra.mxu1 %v927_v9 }
  0x69   : > { %812 = vmatmul.mubr.bf16.vlgmr.msra.gmra.mxu0 %v930_v10  ;;  %828 = vmatmul.mubr.bf16.vlgmr.msra.gmra.mxu1 %v931_v11 }
  0x6a   : > { %815 = vmatprep.mubr.bf16.mxu0 %v932_v12  ;;  %831 = vmatprep.mubr.bf16.mxu1 %v933_v13 }
  0x71   : > { %816 = vmatmul.mubr.bf16.gmra.mxu0 %v934_v14  ;;  %832 = vmatmul.mubr.bf16.gmra.mxu1 %v935_v15 }
  0x72   : > { %819 = vmatprep.mubr.bf16.mxu0 %v936_v16  ;;  %835 = vmatprep.mubr.bf16.mxu1 %v937_v17 }
  0x79   : > { %820 = vmatmul.mubr.bf16.gmra.mxu0 %v938_v18  ;;  %836 = vmatmul.mubr.bf16.gmra.mxu1 %v939_v19 }
  0x7a   : > { %823 = vmatprep.mubr.bf16.mxu0 %v940_v20  ;;  %839 = vmatprep.mubr.bf16.mxu1 %v941_v21 }
  0x81   : > { %824 = vmatmul.mubr.bf16.gmra.mxu0 %v942_v22  ;;  %840 = vmatmul.mubr.bf16.gmra.mxu1 %v943_v23 }
 0x129   : > { %v813_v25 = vpop.f32.mrf.mxu0  ;;  %v829_v26 = vpop.f32.mrf.mxu1 }
 0x12a   : > { %v449_v27 = vadd.f32 %v813_v25, %v1250_v24  ;;  %v513_v28 = vadd.f32 %v829_v26, %v1250_v24 }
 0x12b   : > { %v440_v29 = vpop.f32.mrf.mxu0  ;;  %v504_v30 = vpop.f32.mrf.mxu1 }
 0x12c   : > { %v569_v31 = vmax.f32 %v449_v27, 0.0  ;;  %v585_v32 = vmax.f32 %v513_v28, 0.0  ;;  %v441_v33 = vadd.f32 %v1250_v24, %v440_v29  ;;  %v505_v34 = vadd.f32 %v1250_v24, %v504_v30 }
 0x12d   : > { %v814_v35 = vpop.f32.mrf.mxu0  ;;  %v830_v36 = vpop.f32.mrf.mxu1 }
 0x12e   : > { %601 = vst [vmem:[%s1257_s29 + $0x10] sm:$0xff] %v569_v31  ;;  %617 = vst [vmem:[%s1257_s29 + $0x90] sm:$0xff] %v585_v32  ;;  %v567_v37 = vmax.f32 %v441_v33, 0.0  ;;  %v583_v38 = vmax.f32 %v505_v34, 0.0  ;;  %v452_v39 = vadd.f32 %v814_v35, %v1250_v24  ;;  %v516_v40 = vadd.f32 %v830_v36, %v1250_v24 }
 0x12f   : > { %v443_v41 = vpop.f32.mrf.mxu0  ;;  %v507_v42 = vpop.f32.mrf.mxu1 }
 0x130   : > { %599 = vst [vmem:[%s1257_s29] sm:$0xff] %v567_v37  ;;  %615 = vst [vmem:[%s1257_s29 + $0x80] sm:$0xff] %v583_v38  ;;  %v570_v43 = vmax.f32 %v452_v39, 0.0  ;;  %v586_v44 = vmax.f32 %v516_v40, 0.0  ;;  %v444_v45 = vadd.f32 %v1250_v24, %v443_v41  ;;  %v508_v46 = vadd.f32 %v1250_v24, %v507_v42 }
 0x131   : > { %v817_v47 = vpop.f32.mrf.mxu0  ;;  %v833_v48 = vpop.f32.mrf.mxu1 }
 0x132   : > { %602 = vst [vmem:[%s1257_s29 + $0x18] sm:$0xff] %v570_v43  ;;  %618 = vst [vmem:[%s1257_s29 + $0x98] sm:$0xff] %v586_v44  ;;  %v568_v49 = vmax.f32 %v444_v45, 0.0  ;;  %v584_v50 = vmax.f32 %v508_v46, 0.0  ;;  %v465_v51 = vadd.f32 %v817_v47, %v1250_v24  ;;  %v529_v52 = vadd.f32 %v833_v48, %v1250_v24 }
 0x133   : > { %v456_v53 = vpop.f32.mrf.mxu0  ;;  %v520_v54 = vpop.f32.mrf.mxu1 }
 0x134   : > { %600 = vst [vmem:[%s1257_s29 + $0x8] sm:$0xff] %v568_v49  ;;  %616 = vst [vmem:[%s1257_s29 + $0x88] sm:$0xff] %v584_v50  ;;  %v573_v55 = vmax.f32 %v465_v51, 0.0  ;;  %v589_v56 = vmax.f32 %v529_v52, 0.0  ;;  %v457_v57 = vadd.f32 %v1250_v24, %v456_v53  ;;  %v521_v58 = vadd.f32 %v1250_v24, %v520_v54 }
 0x135   : > { %v818_v59 = vpop.f32.mrf.mxu0  ;;  %v834_v60 = vpop.f32.mrf.mxu1 }
 0x136   : > { %605 = vst [vmem:[%s1257_s29 + $0x30] sm:$0xff] %v573_v55  ;;  %621 = vst [vmem:[%s1257_s29 + $0xb0] sm:$0xff] %v589_v56  ;;  %v571_v61 = vmax.f32 %v457_v57, 0.0  ;;  %v587_v62 = vmax.f32 %v521_v58, 0.0  ;;  %v468_v63 = vadd.f32 %v818_v59, %v1250_v24  ;;  %v532_v0 = vadd.f32 %v834_v60, %v1250_v24 }
 0x137   : > { %v459_v1 = vpop.f32.mrf.mxu0  ;;  %v523_v2 = vpop.f32.mrf.mxu1 }
 0x138   : > { %603 = vst [vmem:[%s1257_s29 + $0x20] sm:$0xff] %v571_v61  ;;  %619 = vst [vmem:[%s1257_s29 + $0xa0] sm:$0xff] %v587_v62  ;;  %v574_v3 = vmax.f32 %v468_v63, 0.0  ;;  %v590_v4 = vmax.f32 %v532_v0, 0.0  ;;  %v460_v5 = vadd.f32 %v1250_v24, %v459_v1  ;;  %v524_v6 = vadd.f32 %v1250_v24, %v523_v2 }
 0x139   : > { %v821_v7 = vpop.f32.mrf.mxu0  ;;  %v837_v8 = vpop.f32.mrf.mxu1 }
 0x13a   : > { %606 = vst [vmem:[%s1257_s29 + $0x38] sm:$0xff] %v574_v3  ;;  %622 = vst [vmem:[%s1257_s29 + $0xb8] sm:$0xff] %v590_v4  ;;  %v572_v9 = vmax.f32 %v460_v5, 0.0  ;;  %v588_v10 = vmax.f32 %v524_v6, 0.0  ;;  %v481_v11 = vadd.f32 %v821_v7, %v1250_v24  ;;  %v545_v12 = vadd.f32 %v837_v8, %v1250_v24 }
 0x13b   : > { %v472_v13 = vpop.f32.mrf.mxu0  ;;  %v536_v14 = vpop.f32.mrf.mxu1 }
 0x13c   : > { %604 = vst [vmem:[%s1257_s29 + $0x28] sm:$0xff] %v572_v9  ;;  %620 = vst [vmem:[%s1257_s29 + $0xa8] sm:$0xff] %v588_v10  ;;  %v577_v15 = vmax.f32 %v481_v11, 0.0  ;;  %v593_v16 = vmax.f32 %v545_v12, 0.0  ;;  %v473_v17 = vadd.f32 %v1250_v24, %v472_v13  ;;  %v537_v18 = vadd.f32 %v1250_v24, %v536_v14 }
 0x13d   : > { %v822_v19 = vpop.f32.mrf.mxu0  ;;  %v838_v20 = vpop.f32.mrf.mxu1 }
 0x13e   : > { %609 = vst [vmem:[%s1257_s29 + $0x50] sm:$0xff] %v577_v15  ;;  %625 = vst [vmem:[%s1257_s29 + $0xd0] sm:$0xff] %v593_v16  ;;  %v575_v21 = vmax.f32 %v473_v17, 0.0  ;;  %v591_v22 = vmax.f32 %v537_v18, 0.0  ;;  %v484_v23 = vadd.f32 %v822_v19, %v1250_v24  ;;  %v548_v25 = vadd.f32 %v838_v20, %v1250_v24 }
 0x13f   : > { %v475_v26 = vpop.f32.mrf.mxu0  ;;  %v539_v27 = vpop.f32.mrf.mxu1 }
 0x140   : > { %607 = vst [vmem:[%s1257_s29 + $0x40] sm:$0xff] %v575_v21  ;;  %623 = vst [vmem:[%s1257_s29 + $0xc0] sm:$0xff] %v591_v22  ;;  %v578_v28 = vmax.f32 %v484_v23, 0.0  ;;  %v594_v29 = vmax.f32 %v548_v25, 0.0  ;;  %v476_v30 = vadd.f32 %v1250_v24, %v475_v26  ;;  %v540_v31 = vadd.f32 %v1250_v24, %v539_v27 }
 0x141   : > { %v825_v32 = vpop.f32.mrf.mxu0  ;;  %v841_v33 = vpop.f32.mrf.mxu1 }
 0x142   : > { %610 = vst [vmem:[%s1257_s29 + $0x58] sm:$0xff] %v578_v28  ;;  %626 = vst [vmem:[%s1257_s29 + $0xd8] sm:$0xff] %v594_v29  ;;  %v576_v34 = vmax.f32 %v476_v30, 0.0  ;;  %v592_v35 = vmax.f32 %v540_v31, 0.0  ;;  %v497_v36 = vadd.f32 %v825_v32, %v1250_v24  ;;  %v561_v37 = vadd.f32 %v841_v33, %v1250_v24 }
 0x143   : > { %v488_v38 = vpop.f32.mrf.mxu0  ;;  %v552_v39 = vpop.f32.mrf.mxu1 }
 0x144   : > { %608 = vst [vmem:[%s1257_s29 + $0x48] sm:$0xff] %v576_v34  ;;  %624 = vst [vmem:[%s1257_s29 + $0xc8] sm:$0xff] %v592_v35  ;;  %v581_v40 = vmax.f32 %v497_v36, 0.0  ;;  %v597_v41 = vmax.f32 %v561_v37, 0.0  ;;  %v489_v42 = vadd.f32 %v1250_v24, %v488_v38  ;;  %v553_v43 = vadd.f32 %v1250_v24, %v552_v39 }
 0x145   : > { %v826_v44 = vpop.f32.mrf.mxu0  ;;  %v842_v45 = vpop.f32.mrf.mxu1 }
 0x146   : > { %613 = vst [vmem:[%s1257_s29 + $0x70] sm:$0xff] %v581_v40  ;;  %629 = vst [vmem:[%s1257_s29 + $0xf0] sm:$0xff] %v597_v41  ;;  %v579_v46 = vmax.f32 %v489_v42, 0.0  ;;  %v595_v47 = vmax.f32 %v553_v43, 0.0  ;;  %v500_v48 = vadd.f32 %v826_v44, %v1250_v24  ;;  %v564_v49 = vadd.f32 %v842_v45, %v1250_v24 }
 0x147   : > { %v491_v50 = vpop.f32.mrf.mxu0  ;;  %v555_v51 = vpop.f32.mrf.mxu1 }
 0x148   : > { %611 = vst [vmem:[%s1257_s29 + $0x60] sm:$0xff] %v579_v46  ;;  %627 = vst [vmem:[%s1257_s29 + $0xe0] sm:$0xff] %v595_v47  ;;  %v582_v52 = vmax.f32 %v500_v48, 0.0  ;;  %v598_v53 = vmax.f32 %v564_v49, 0.0  ;;  %v492_v54 = vadd.f32 %v1250_v24, %v491_v50  ;;  %v556_v55 = vadd.f32 %v1250_v24, %v555_v51 }
 0x14a   : > { %614 = vst [vmem:[%s1257_s29 + $0x78] sm:$0xff] %v582_v52  ;;  %630 = vst [vmem:[%s1257_s29 + $0xf8] sm:$0xff] %v598_v53  ;;  %v580_v56 = vmax.f32 %v492_v54, 0.0  ;;  %v596_v57 = vmax.f32 %v556_v55, 0.0 }
 0x14c   : > { %612 = vst [vmem:[%s1257_s29 + $0x68] sm:$0xff] %v580_v56  ;;  %628 = vst [vmem:[%s1257_s29 + $0xe8] sm:$0xff] %v596_v57 }
 0x14d   : > { %1011 = shalt.err (!%p1008_p0)
}
 0x14e   : > { %s1012_s21 = scalar_lea.hbm %s1320_s8, 4096  ;;  %s1016_s4 = scalar_lea.hbm %s1372_s3, 8192 }
 0x14f   : > { %p1013_p5 = scmp.ne.s32.totalorder %s1320_s8, %s1012_s21  ;;  %p1017_p4 = scmp.lt.s32.totalorder %s1320_s8, %s1372_s3 }
 0x150   : > { %p1018_p6 = scmp.lt.s32.totalorder %s1016_s4, %s1012_s21 }
 0x151   : > { %p1014_p2 = pnand %p1013_p5, %p1388_p11 }
 0x152   : > { %p1019_p8 = por %p1018_p6, %p1017_p4 }
 0x153   : > { %p1015_p1 = pneg %p1014_p2 }
 0x155   : > { %p1020_p3 = pnand %p1019_p8, %p1015_p1 }
 0x157   : > { %1023 = shalt.err (!%p1020_p3)
}
 0x158   : > { %s1073_s28 = smov 128   ;;  %s1074_s29 = smov 8  }
 0x159   : > { %865 = dma.vmem_to_hbm [thread:$0]  (%p1388_p11), %s1322_s22, 4096, %s1320_s8, %s632_s16, %s1073_s28, %s1073_s28, %s1074_s29  }
 0x15a PF: > { %s660_s17 = sand.u32 1, %s1054_s12   ;;  %p1389_p7 = scmp.ne.s32.totalorder %s1378_s19, 0 }
 0x15b   : > { %p1390_p9 = scmp.ge.s32.totalorder %s1066_s15, 2  ;;  %s661_s23 = scalar_lea.sflag [#allocation4], %s660_s17 }
 0x15d   : > { %p876_p10 = pnand %p1390_p9, %p1389_p7 }
 0x15f   : > { %p877_p12 = pneg %p876_p10 }
 0x161   : > { %1049 = dma.done.wait (%p877_p12), %s661_s23, 4096  }
 0x162   : > { %1051 = vsyncadd (%p877_p12), %s661_s23, 4294963200  ;;  %p17_p13 = scmp.ge.s32.totalorder %s1149_s24, 4   ;;  %s1391_s12 = smov %s1058_s13 }
 0x163   : > { %s1392_s13 = smov %s1062_s14  ;;  %s1393_s14 = smov %s1169_s5 }
 0x164   : > { %s1394_s15 = smov %s1149_s24  ;;  %19 = sbr.rel (!%p17_p13) target bundleno = 6 (0x6), region = 81 }
 0x169   :  { %666 = vsyncpa [#allocation3], 1 }
 0x16a   :  { %668 = vsyncpa [#allocation3 + $0x1], 1 }
 0x16b   :  { %669 = vsyncpa [#allocation6], 1 }
 0x16c   :  { %670 = vsyncpa [#allocation4], 1 }
 0x16d   :  { %672 = vsyncpa [#allocation4 + $0x1], 1 }

</bundles_post_ra>
